<compile_context>
chip_gen: v7x
topology: tpu7x:2x2x1
jax: 0.10.0
libtpu: 0.0.40
codegen_flags: <defaults>
</compile_context>

<pallas_src>
import math

import jax
import jax.numpy as jnp
from jax.experimental import pallas as pl
from jax.experimental.pallas import tpu as pltpu

# Model hyperparameters (Net(N_in=2, N_out=1, N_hid=30, N_layers=3))
N_IN = 2
N_OUT = 1
N_HID = 30
N_LAYERS = 3

_BIAS_SLOT = 32      # sublane-aligned slot per layer in the packed bias column
_LANE = 128          # TPU lane width
_MAX_TILE = 2048     # batch rows per grid step for large batches


def mlp_kernel(xt_ref, w1_ref, w2_ref, w3_ref, w4_ref, b_ref, out_ref):
    """Fused 4-layer MLP on one batch tile, batch-on-lanes layout.

    xt_ref : (N_IN, TM)          batch tile, batch on the lane axis
    w*_ref : (out, in)           PyTorch nn.Linear weight layout (no transpose)
    b_ref  : (4*_BIAS_SLOT, 1)   packed biases, one 32-row slot per layer
    out_ref: (N_OUT, TM)         lane-dense output tile
    """
    b = b_ref[...]
    b1 = b[0 * _BIAS_SLOT: 0 * _BIAS_SLOT + N_HID]
    b2 = b[1 * _BIAS_SLOT: 1 * _BIAS_SLOT + N_HID]
    b3 = b[2 * _BIAS_SLOT: 2 * _BIAS_SLOT + N_HID]
    b4 = b[3 * _BIAS_SLOT: 3 * _BIAS_SLOT + N_OUT]

    h = xt_ref[...]                                                   # (N_IN, TM)
    h = jnp.tanh(jnp.dot(w1_ref[...], h,
                         preferred_element_type=jnp.float32) + b1)    # (N_HID, TM)
    h = jnp.tanh(jnp.dot(w2_ref[...], h,
                         preferred_element_type=jnp.float32) + b2)
    h = jnp.tanh(jnp.dot(w3_ref[...], h,
                         preferred_element_type=jnp.float32) + b3)
    out = jnp.dot(w4_ref[...], h,
                  preferred_element_type=jnp.float32) + b4            # (N_OUT, TM)
    out_ref[...] = out.astype(out_ref.dtype)


def net_forward(x, t, params, *, max_tile=_MAX_TILE):
    """Pallas equivalent of Net.forward(x, t).

    x: (N, 1) float32, t: (N, 1) float32 -> (N, N_OUT) float32
    Works for arbitrary N (padded internally to a multiple of 128 lanes).
    """
    xt = jnp.concatenate([x, t], axis=1)                              # (N, N_IN)
    n = xt.shape[0]

    # One large lane-dense tile: whole padded batch when small, chunks when big.
    n_pad = pl.cdiv(n, _LANE) * _LANE
    if n_pad <= max_tile:
        tile_m = n_pad
    else:
        tile_m = max_tile
        n_pad = pl.cdiv(n, tile_m) * tile_m
    grid = (n_pad // tile_m,)

    # Batch-on-lanes input: (N_IN, n_pad), zero-padded tail lanes.
    xt_t = jnp.zeros((N_IN, n_pad), jnp.float32).at[:, :n].set(xt.T)

    (w1, b1), (w2, b2), (w3, b3), (w4, b4) = params

    # Pack the four biases into one sublane-aligned column (fewer DMA windows).
    b_all = jnp.zeros((4 * _BIAS_SLOT, 1), jnp.float32)
    b_all = b_all.at[0 * _BIAS_SLOT: 0 * _BIAS_SLOT + N_HID].set(b1)
    b_all = b_all.at[1 * _BIAS_SLOT: 1 * _BIAS_SLOT + N_HID].set(b2)
    b_all = b_all.at[2 * _BIAS_SLOT: 2 * _BIAS_SLOT + N_HID].set(b3)
    b_all = b_all.at[3 * _BIAS_SLOT: 3 * _BIAS_SLOT + N_OUT].set(b4)

    def const_spec(shape):
        # Parameters: same (whole-array) tile at every grid step.
        return pl.BlockSpec(shape, lambda i: (0, 0))

    out_t = pl.pallas_call(
        mlp_kernel,
        out_shape=jax.ShapeDtypeStruct((N_OUT, n_pad), jnp.float32),
        grid=grid,
        in_specs=[
            pl.BlockSpec((N_IN, tile_m), lambda i: (0, i)),   # xt tile (lane-dense)
            const_spec((N_HID, N_IN)),                         # W1
            const_spec((N_HID, N_HID)),                        # W2
            const_spec((N_HID, N_HID)),                        # W3
            const_spec((N_OUT, N_HID)),                        # W4
            const_spec((4 * _BIAS_SLOT, 1)),                   # packed biases
        ],
        out_specs=pl.BlockSpec((N_OUT, tile_m), lambda i: (0, i)),
        compiler_params=pltpu.CompilerParams(
            dimension_semantics=("parallel",) if grid[0] > 1 else ("arbitrary",)),
    )(xt_t, w1, w2, w3, w4, b_all)

    return out_t[:, :n].T                                      # (N, N_OUT)


def init_params(key):
    """torch.nn.Linear-style init: U(-1/sqrt(fan_in), 1/sqrt(fan_in)).

    Weights kept in PyTorch (out_features, in_features) layout; biases (out, 1).
    """
    dims = [N_IN] + [N_HID] * N_LAYERS + [N_OUT]
    params = []
    for fan_in, fan_out in zip(dims[:-1], dims[1:]):
        key, kw, kb = jax.random.split(key, 3)
        bound = 1.0 / math.sqrt(fan_in)
        w = jax.random.uniform(kw, (fan_out, fan_in), jnp.float32, -bound, bound)
        b = jax.random.uniform(kb, (fan_out, 1), jnp.float32, -bound, bound)
        params.append((w, b))
    return params


def net_forward_ref(x, t, params):
    """Pure-JAX reference for correctness checking."""
    h = jnp.concatenate([x, t], axis=1)
    n_layers = len(params)
    for i, (w, b) in enumerate(params):
        h = h @ w.T + b.T
        if i < n_layers - 1:
            h = jnp.tanh(h)
    return h


if __name__ == "__main__":
    key = jax.random.PRNGKey(0)
    kp, kx, kt = jax.random.split(key, 3)

    params = init_params(kp)

    N = 100  # small batch of (x, t) collocation points (non-multiple of 128 on purpose)
    x = jax.random.uniform(kx, (N, 1), jnp.float32, -1.0, 1.0)
    t = jax.random.uniform(kt, (N, 1), jnp.float32, 0.0, 1.0)

    out = net_forward(x, t, params)
    out = jax.block_until_ready(out)

    ref = net_forward_ref(x, t, params)
    assert out.shape == (N, N_OUT)
    assert jnp.allclose(out, ref, atol=1e-5, rtol=1e-5), "mismatch vs JAX reference"

    # TODO(synk): PDE()/loss_* need autodiff w.r.t. the inputs (and Adam updates);
    # only the forward pass is implemented as a Pallas kernel here.
    print("KERNEL_OK")
</pallas_src>

<mosaic_0001>
module attributes {stable_mosaic.version = 11 : i64} {
  func.func @mlp_kernel(%arg0: i32, %arg1: memref<2x128xf32, #tpu.memory_space<vmem>>, %arg2: memref<30x2xf32, #tpu.memory_space<vmem>>, %arg3: memref<30x30xf32, #tpu.memory_space<vmem>>, %arg4: memref<30x30xf32, #tpu.memory_space<vmem>>, %arg5: memref<1x30xf32, #tpu.memory_space<vmem>>, %arg6: memref<128x1xf32, #tpu.memory_space<vmem>>, %arg7: memref<1x128xf32, #tpu.memory_space<vmem>>) attributes {dimension_semantics = [#tpu.dimension_semantics<arbitrary>], iteration_bounds = array<i64: 1>, scalar_prefetch = 0 : i64, scratch_operands = 0 : i64, tpu.core_type = #tpu.core_type<tc>, window_params = [{transform_indices = @transform_0, window_bounds = array<i64: 2, 128>}, {pipeline_mode = #tpu.pipeline_mode<synchronous>, transform_indices = @transform_1, window_bounds = array<i64: 30, 2>}, {pipeline_mode = #tpu.pipeline_mode<synchronous>, transform_indices = @transform_2, window_bounds = array<i64: 30, 30>}, {pipeline_mode = #tpu.pipeline_mode<synchronous>, transform_indices = @transform_3, window_bounds = array<i64: 30, 30>}, {pipeline_mode = #tpu.pipeline_mode<synchronous>, transform_indices = @transform_4, window_bounds = array<i64: 1, 30>}, {pipeline_mode = #tpu.pipeline_mode<synchronous>, transform_indices = @transform_5, window_bounds = array<i64: 128, 1>}, {transform_indices = @transform_6, window_bounds = array<i64: 1, 128>}]} {
    %c0 = arith.constant 0 : index
    %c0_0 = arith.constant 0 : index
    %0 = vector.load %arg6[%c0, %c0_0] : memref<128x1xf32, #tpu.memory_space<vmem>>, vector<128x1xf32>
    %1 = vector.extract_strided_slice %0 {offsets = [0, 0], sizes = [30, 1], strides = [1, 1]} : vector<128x1xf32> to vector<30x1xf32>
    %2 = vector.extract_strided_slice %0 {offsets = [32, 0], sizes = [30, 1], strides = [1, 1]} : vector<128x1xf32> to vector<30x1xf32>
    %3 = vector.extract_strided_slice %0 {offsets = [64, 0], sizes = [30, 1], strides = [1, 1]} : vector<128x1xf32> to vector<30x1xf32>
    %4 = vector.extract_strided_slice %0 {offsets = [96, 0], sizes = [1, 1], strides = [1, 1]} : vector<128x1xf32> to vector<1x1xf32>
    %c0_1 = arith.constant 0 : index
    %c0_2 = arith.constant 0 : index
    %5 = vector.load %arg1[%c0_1, %c0_2] : memref<2x128xf32, #tpu.memory_space<vmem>>, vector<2x128xf32>
    %c0_3 = arith.constant 0 : index
    %c0_4 = arith.constant 0 : index
    %6 = vector.load %arg2[%c0_3, %c0_4] : memref<30x2xf32, #tpu.memory_space<vmem>>, vector<30x2xf32>
    %cst = arith.constant dense<0.000000e+00> : vector<30x128xf32>
    %7 = tpu.matmul %6, %5, %cst {dimension_numbers = #tpu.dot_dimension_numbers<[1], [0], [0], [1], [0, 0, 1, 1], [], []>} : vector<30x2xf32>, vector<2x128xf32>, vector<30x128xf32> -> vector<30x128xf32>
    %8 = vector.broadcast %1 : vector<30x1xf32> to vector<30x128xf32>
    %9 = arith.addf %7, %8 : vector<30x128xf32>
    %10 = math.tanh %9 : vector<30x128xf32>
    %c0_5 = arith.constant 0 : index
    %c0_6 = arith.constant 0 : index
    %11 = vector.load %arg3[%c0_5, %c0_6] : memref<30x30xf32, #tpu.memory_space<vmem>>, vector<30x30xf32>
    %cst_7 = arith.constant dense<0.000000e+00> : vector<30x128xf32>
    %12 = tpu.matmul %11, %10, %cst_7 {dimension_numbers = #tpu.dot_dimension_numbers<[1], [0], [0], [1], [0, 0, 1, 1], [], []>} : vector<30x30xf32>, vector<30x128xf32>, vector<30x128xf32> -> vector<30x128xf32>
    %13 = vector.broadcast %2 : vector<30x1xf32> to vector<30x128xf32>
    %14 = arith.addf %12, %13 : vector<30x128xf32>
    %15 = math.tanh %14 : vector<30x128xf32>
    %c0_8 = arith.constant 0 : index
    %c0_9 = arith.constant 0 : index
    %16 = vector.load %arg4[%c0_8, %c0_9] : memref<30x30xf32, #tpu.memory_space<vmem>>, vector<30x30xf32>
    %cst_10 = arith.constant dense<0.000000e+00> : vector<30x128xf32>
    %17 = tpu.matmul %16, %15, %cst_10 {dimension_numbers = #tpu.dot_dimension_numbers<[1], [0], [0], [1], [0, 0, 1, 1], [], []>} : vector<30x30xf32>, vector<30x128xf32>, vector<30x128xf32> -> vector<30x128xf32>
    %18 = vector.broadcast %3 : vector<30x1xf32> to vector<30x128xf32>
    %19 = arith.addf %17, %18 : vector<30x128xf32>
    %20 = math.tanh %19 : vector<30x128xf32>
    %c0_11 = arith.constant 0 : index
    %c0_12 = arith.constant 0 : index
    %21 = vector.load %arg5[%c0_11, %c0_12] : memref<1x30xf32, #tpu.memory_space<vmem>>, vector<1x30xf32>
    %cst_13 = arith.constant dense<0.000000e+00> : vector<1x128xf32>
    %22 = tpu.matmul %21, %20, %cst_13 {dimension_numbers = #tpu.dot_dimension_numbers<[1], [0], [0], [1], [0, 0, 1, 1], [], []>} : vector<1x30xf32>, vector<30x128xf32>, vector<1x128xf32> -> vector<1x128xf32>
    %23 = vector.broadcast %4 : vector<1x1xf32> to vector<1x128xf32>
    %24 = arith.addf %22, %23 : vector<1x128xf32>
    %c0_14 = arith.constant 0 : index
    %c0_15 = arith.constant 0 : index
    %25 = vector.load %arg7[%c0_14, %c0_15] : memref<1x128xf32, #tpu.memory_space<vmem>>, vector<1x128xf32>
    tpu.vector_store %arg7[%c0_14, %c0_15], %24 {strides = array<i32>} : memref<1x128xf32, #tpu.memory_space<vmem>>, vector<1x128xf32>,
    return
  }
  func.func @transform_0(%arg0: i32) -> (i32, i32) {
    %c0_i32 = arith.constant 0 : i32
    %c0_i32_0 = arith.constant 0 : i32
    return %c0_i32, %arg0 : i32, i32
  }
  func.func @transform_1(%arg0: i32) -> (i32, i32) {
    %c0_i32 = arith.constant 0 : i32
    %c0_i32_0 = arith.constant 0 : i32
    %c0_i32_1 = arith.constant 0 : i32
    return %c0_i32, %c0_i32_0 : i32, i32
  }
  func.func @transform_2(%arg0: i32) -> (i32, i32) {
    %c0_i32 = arith.constant 0 : i32
    %c0_i32_0 = arith.constant 0 : i32
    %c0_i32_1 = arith.constant 0 : i32
    return %c0_i32, %c0_i32_0 : i32, i32
  }
  func.func @transform_3(%arg0: i32) -> (i32, i32) {
    %c0_i32 = arith.constant 0 : i32
    %c0_i32_0 = arith.constant 0 : i32
    %c0_i32_1 = arith.constant 0 : i32
    return %c0_i32, %c0_i32_0 : i32, i32
  }
  func.func @transform_4(%arg0: i32) -> (i32, i32) {
    %c0_i32 = arith.constant 0 : i32
    %c0_i32_0 = arith.constant 0 : i32
    %c0_i32_1 = arith.constant 0 : i32
    return %c0_i32, %c0_i32_0 : i32, i32
  }
  func.func @transform_5(%arg0: i32) -> (i32, i32) {
    %c0_i32 = arith.constant 0 : i32
    %c0_i32_0 = arith.constant 0 : i32
    %c0_i32_1 = arith.constant 0 : i32
    return %c0_i32, %c0_i32_0 : i32, i32
  }
  func.func @transform_6(%arg0: i32) -> (i32, i32) {
    %c0_i32 = arith.constant 0 : i32
    %c0_i32_0 = arith.constant 0 : i32
    return %c0_i32, %arg0 : i32, i32
  }
}

</mosaic_0001>

<bundles_post_ra>
// kernel: tpu_custom_call.1
= control target key start
LH: loop header
LB: loop body
LE: loop exit
PB: predicated region body
PF: predicated region fallthrough
CT: control target
= control target key end

     0   :  { %vm75_vm0 = vcmask 1041408   ;;  %vm62_vm1 = vcmask 15360   ;;  %v696_v5 = vmov 0   ;;  %s857_s0 = inlined_call_operand.vmem [shape: f32[2,128], index: 0, kind: input, shape index: {}]   ;;  %s858_s1 = inlined_call_operand.vmem [shape: f32[30,2], index: 1, kind: input, shape index: {}]   ;;  %s859_s2 = inlined_call_operand.vmem [shape: f32[30,30], index: 2, kind: input, shape index: {}]   ;;  %s860_s3 = inlined_call_operand.vmem [shape: f32[30,30], index: 3, kind: input, shape index: {}]   ;;  %s861_s4 = inlined_call_operand.vmem [shape: f32[1,30], index: 4, kind: input, shape index: {}]   ;;  %s862_s5 = inlined_call_operand.vmem [shape: f32[128,1], index: 5, kind: input, shape index: {}]   ;;  %s863_s6 = inlined_call_operand.hbm [shape: f32[1,128], index: 6, kind: output, shape index: {}]  }
   0x1   :  { %v37_v0 = vld [vmem:[%s857_s0] sm:$0x3]  ;;  %v39_v2 = vld [vmem:[%s858_s1 + $0x8] sm:$0xff]  ;;  %v40_v3 = vld [vmem:[%s858_s1 + $0x10] sm:$0xff]  ;;  %646 = vset.pattern.permute.xlu0 %v696_v5  ;;  %647 = vset.pattern.permute.xlu1 %v696_v5 }
   0x2   :  { %v38_v1 = vld [vmem:[%s858_s1] sm:$0xff]  ;;  %566 = vmatprep.subr.msk.mxu0 %vm75_vm0, %v37_v0  ;;  %v26_v6 = vld [vmem:[%s862_s5 + $0x10] sm:$0xff]  ;;  %v41_v7 = vld [vmem:[%s858_s1 + $0x18] sm:$0x3f] }
   0x3   :  { %568 = vmatprep.mubr.msk.f32.mxu0 %vm62_vm1, %v38_v1  ;;  %v24_v4 = vld [vmem:[%s862_s5] sm:$0xff]  ;;  %567 = vmatpush3.msk.msra.mxu0 %vm75_vm0, %v37_v0  ;;  %v25_v8 = vld [vmem:[%s862_s5 + $0x8] sm:$0xff]  ;;  %v27_v9 = vld [vmem:[%s862_s5 + $0x18] sm:$0xff] }
   0x4   :  { %569 = vmatmul.mubr.msk.f32.vlgmr.msra.gmra.mrb[0].mxu0 %vm62_vm1, %v39_v2  ;;  %44 = vperm.xlu0 %646, %v24_v4  }
   0x5   :  { %571 = vmatprep.mubr.msk.f32.mxu0 %vm62_vm1, %v40_v3  ;;  %54 = vperm.xlu1 %647, %v26_v6  }
   0x6   :  { %11 = vsyncpa [#allocation3], 0  ;;  %v28_v10 = vld [vmem:[%s862_s5 + $0x20] sm:$0xff]  ;;  %v29_v11 = vld [vmem:[%s862_s5 + $0x28] sm:$0xff]  ;;  %vm192_vm2 = vcmask 244736   ;;  %vm205_vm3 = vcmask 1045504  }
   0x7   :  { %v30_v12 = vld [vmem:[%s862_s5 + $0x30] sm:$0xff]  ;;  %v31_v13 = vld [vmem:[%s862_s5 + $0x38] sm:$0xff]  ;;  %v32_v14 = vld [vmem:[%s862_s5 + $0x40] sm:$0xff]  ;;  %vm697_vm4 = vmmov 1   ;;  %v698_v0 = vmov 0.0|0.0   ;;  %vm699_vm6 = vmmov 0  }
   0x8   :  { %572 = vmatmul.mubr.msk.f32.gmra.mrb[2].mxu0 %vm62_vm1, %v41_v7  ;;  %49 = vperm.xlu0 %646, %v25_v8   ;;  %v33_v15 = vld [vmem:[%s862_s5 + $0x48] sm:$0xff]  ;;  %v34_v16 = vld [vmem:[%s862_s5 + $0x50] sm:$0xff]  ;;  %v35_v17 = vld [vmem:[%s862_s5 + $0x58] sm:$0xff]  ;;  %v700_v1 = vmov 0.0   ;;  %s701_s20 = smov [#allocation2]  }
   0x9   :  { %59 = vperm.xlu1 %647, %v27_v9   ;;  %v36_v18 = vld [vmem:[%s862_s5 + $0x60] sm:$0xff]  ;;  %vm799_vm5 = vmpackc.low %vm205_vm3, %vm697_vm4  ;;  %v169_v39 = vld [vmem:[%s859_s2 + $0x8] sm:$0xff]  ;;  %s515_s21 = sshll.u32 %s701_s20, 4  ;;  %s516_s21 = int_to_ptr.vmem [resolvable:$true] %s515_s21 }
   0xa   :  { %v168_v19 = vld [vmem:[%s859_s2] sm:$0xff]  ;;  %v170_v40 = vld [vmem:[%s859_s2 + $0x10] sm:$0xff]  ;;  %v171_v41 = vld [vmem:[%s859_s2 + $0x18] sm:$0x3f]  ;;  %s672_s22 = scalar_lea.vmem %s516_s21, 16  ;;  %s676_s23 = scalar_lea.vmem %s516_s21, 32 }
   0xb   :  { %582 = vmatprep.mubr.msk.f32.mxu1 %vm192_vm2, %v168_v19  ;;  %v298_v42 = vld [vmem:[%s860_s3] sm:$0xff]  ;;  %v299_v61 = vld [vmem:[%s860_s3 + $0x8] sm:$0xff]  ;;  %v300_v62 = vld [vmem:[%s860_s3 + $0x10] sm:$0xff]  ;;  %p673_p0 = scmp.ne.s32.totalorder %s516_s21, %s672_s22  ;;  %p677_p1 = scmp.lt.s32.totalorder %s516_s21, %s516_s21 }
   0xc   :  { %174 = vperm.xlu0 %646, %v28_v10   ;;  %596 = vmatprep.mubr.msk.f32.mxu0 %vm192_vm2, %v298_v42  ;;  %v301_v63 = vld [vmem:[%s860_s3 + $0x18] sm:$0x3f]  ;;  %p678_p2 = scmp.lt.s32.totalorder %s676_s23, %s672_s22 }
   0xd   :  { %179 = vperm.xlu1 %647, %v29_v11  }
   0xe   :  { %p679_p3 = por %p678_p2, %p677_p1 }
  0x10   :  { %184 = vperm.xlu0 %646, %v30_v12   ;;  %p680_p4 = pnand %p679_p3, %p673_p0 }
  0x11   :  { %189 = vperm.xlu1 %647, %v31_v13  }
  0x14   :  { %304 = vperm.xlu0 %646, %v32_v14  }
  0x15   :  { %309 = vperm.xlu1 %647, %v33_v15  }
  0x18   :  { %314 = vperm.xlu0 %646, %v34_v16  }
  0x19   :  { %319 = vperm.xlu1 %647, %v35_v17  }
  0x1c   :  { %429 = vperm.xlu0 %646, %v36_v18  }
  0x83   :  { %v45_v20 = vpop.permute.xlu0 %44 }
  0x84   :  { %v55_v21 = vpop.permute.xlu1 %54 }
  0x87   :  { %v50_v22 = vpop.permute.xlu0 %49 }
  0x88   :  { %v60_v27 = vpop.permute.xlu1 %59 }
  0x8b   :  { %v175_v44 = vpop.permute.xlu0 %174 }
  0x8c   :  { %v180_v43 = vpop.permute.xlu1 %179 }
  0x8f   :  { %v185_v51 = vpop.permute.xlu0 %184 }
  0x90   :  { %v190_v49 = vpop.permute.xlu1 %189 }
  0x93   :  { %v305_v3 = vpop.permute.xlu0 %304 }
  0x94   :  { %v310_v2 = vpop.permute.xlu1 %309 }
  0x97   :  { %v315_v10 = vpop.permute.xlu0 %314 }
  0x98   :  { %v320_v8 = vpop.permute.xlu1 %319 }
  0xd7   :  { %v570_v23 = vpop.f32.mrb[0].mxu0 }
  0xd8   :  { %v151_v24 = vadd.f32 %v570_v23, %v50_v22  ;;  %v145_v25 = vpop.f32.mrb[1].mxu0 }
  0xd9   :  { %v146_v26 = vadd.f32 %v145_v25, %v45_v20  ;;  %v426_v20 = vld [vmem:[%s861_s4] sm:$0x1] }
  0xda   :  { %648 = vtanh.f32 %v151_v24 }
  0xdb   :  { %650 = vtanh.f32 %v146_v26  ;;  %v573_v28 = vpop.f32.mrb[2].mxu0 }
  0xdc   :  { %v161_v29 = vadd.f32 %v573_v28, %v60_v27  ;;  %v155_v30 = vpop.f32.mrb[3].mxu0 }
  0xdd   :  { %v156_v31 = vadd.f32 %v155_v30, %v55_v21  ;;  %v430_v21 = vpop.permute.xlu0 %429 }
  0xde   :  { %652 = vtanh.f32 %v161_v29 }
  0xdf   :  { %654 = vtanh.f32 %v156_v31 }
  0xe4   :  { %v649_v32 = vpop.eup %648 }
  0xe5   :  { %v651_v33 = vpop.eup %650 }
  0xe6   :  { %v613_v34 = vpack.c.bf16 %v649_v32, %v651_v33 }
  0xe8   :  { %v653_v35 = vpop.eup %652  ;;  %614 = vmatprep.subr.bf16.mxu1 %v613_v34 }
  0xe9   :  { %v655_v36 = vpop.eup %654  ;;  %616 = vmatpush3.bf16.msra.mxu1 %v613_v34 }
  0xea   :  { %v617_v38 = vpack.c.bf16 %v653_v35, %v655_v36 }
  0xec   :  { %619 = vmatprep.subr.msk.bf16.mxu1 %vm799_vm5, %v617_v38 }
  0xed   :  { %622 = vmatpush3.bf16.msk.msra.mxu1 %vm799_vm5, %v617_v38 }
  0xee   :  { %633 = vmatprep.subr.bf16.mxu1 %v698_v0 }
  0xf0   :  { %583 = vmatmul.mubr.msk.f32.vlgmr.msra.gmra.mrb[0].mxu1 %vm192_vm2, %v169_v39 }
  0xf1   :  { %585 = vmatprep.mubr.msk.f32.mxu1 %vm192_vm2, %v170_v40 }
  0xf4   :  { %586 = vmatmul.mubr.msk.f32.gmra.mrb[2].mxu1 %vm192_vm2, %v171_v41 }
  0xf5   :  { %610 = vmatprep.mubr.msk.f32.mxu1 %vm699_vm6, %v700_v1 }
 0x1c3   :  { %v584_v45 = vpop.f32.mrb[0].mxu1 }
 0x1c4   :  { %v281_v46 = vadd.f32 %v584_v45, %v180_v43  ;;  %v275_v47 = vpop.f32.mrb[1].mxu1 }
 0x1c5   :  { %v276_v48 = vadd.f32 %v275_v47, %v175_v44 }
 0x1c6   :  { %656 = vtanh.f32 %v281_v46 }
 0x1c7   :  { %658 = vtanh.f32 %v276_v48  ;;  %v587_v50 = vpop.f32.mrb[2].mxu1 }
 0x1c8   :  { %v291_v52 = vadd.f32 %v587_v50, %v190_v49  ;;  %v285_v53 = vpop.f32.mrb[3].mxu1 }
 0x1c9   :  { %v286_v54 = vadd.f32 %v285_v53, %v185_v51 }
 0x1ca   :  { %660 = vtanh.f32 %v291_v52 }
 0x1cb   :  { %662 = vtanh.f32 %v286_v54 }
 0x1d0   :  { %v657_v55 = vpop.eup %656 }
 0x1d1   :  { %v659_v56 = vpop.eup %658 }
 0x1d2   :  { %v623_v57 = vpack.c.bf16 %v657_v55, %v659_v56 }
 0x1d4   :  { %v661_v58 = vpop.eup %660  ;;  %624 = vmatprep.subr.bf16.mxu0 %v623_v57 }
 0x1d5   :  { %v663_v59 = vpop.eup %662  ;;  %626 = vmatpush3.bf16.msra.mxu0 %v623_v57 }
 0x1d6   :  { %v627_v60 = vpack.c.bf16 %v661_v58, %v663_v59 }
 0x1d8   :  { %629 = vmatprep.subr.msk.bf16.mxu0 %vm799_vm5, %v627_v60 }
 0x1d9   :  { %632 = vmatpush3.bf16.msk.msra.mxu0 %vm799_vm5, %v627_v60 }
 0x1dc   :  { %597 = vmatmul.mubr.msk.f32.vlgmr.msra.gmra.mrb[4].mxu0 %vm192_vm2, %v299_v61 }
 0x1dd   :  { %599 = vmatprep.mubr.msk.f32.mxu0 %vm192_vm2, %v300_v62 }
 0x1e0   :  { %600 = vmatmul.mubr.msk.f32.gmra.mrb[6].mxu0 %vm192_vm2, %v301_v63 }
 0x2af   :  { %v598_v4 = vpop.f32.mrb[4].mxu0 }
 0x2b0   :  { %v409_v5 = vadd.f32 %v598_v4, %v310_v2  ;;  %v403_v6 = vpop.f32.mrb[5].mxu0 }
 0x2b1   :  { %v404_v7 = vadd.f32 %v403_v6, %v305_v3 }
 0x2b2   :  { %664 = vtanh.f32 %v409_v5 }
 0x2b3   :  { %666 = vtanh.f32 %v404_v7  ;;  %v601_v9 = vpop.f32.mrb[6].mxu0 }
 0x2b4   :  { %v419_v11 = vadd.f32 %v601_v9, %v320_v8  ;;  %v413_v12 = vpop.f32.mrb[7].mxu0 }
 0x2b5   :  { %v414_v13 = vadd.f32 %v413_v12, %v315_v10 }
 0x2b6   :  { %668 = vtanh.f32 %v419_v11 }
 0x2b7   :  { %670 = vtanh.f32 %v414_v13 }
 0x2bc   :  { %v665_v14 = vpop.eup %664 }
 0x2bd   :  { %v667_v15 = vpop.eup %666 }
 0x2be   :  { %v634_v16 = vpack.c.bf16 %v665_v14, %v667_v15 }
 0x2c0   :  { %v669_v17 = vpop.eup %668  ;;  %635 = vmatpush3.bf16.msra.mxu1 %v634_v16 }
 0x2c1   :  { %v671_v18 = vpop.eup %670  ;;  %636 = vmatprep.subr.bf16.mxu1 %v698_v0 }
 0x2c2   :  { %v637_v19 = vpack.c.bf16 %v669_v17, %v671_v18 }
 0x2c4   :  { %639 = vmatpush3.bf16.msk.msra.mxu1 %vm799_vm5, %v637_v19 }
 0x2c7   :  { %611 = vmatmul.mubr.msk.f32.vlgmr.msra.gmra.mrb[4].mxu1 %vm192_vm2, %v426_v20 }
 0x39a   :  { %v504_v22 = vpop.f32.mrb[4].mxu1 }
 0x39b   :  { %v505_v23 = vadd.f32 %v504_v22, %v430_v21  ;;  %v612_v24 = vpop.f32.mrb[5].mxu1 }
 0x39d   :  { %508 = vst [vmem:[#allocation2] sm:$0x1] %v505_v23 }
 0x39e   :  { %683 = shalt.err (!%p680_p4)
}
 0x39f   :  { %s684_s25 = scalar_lea.hbm %s863_s6, 16 }
 0x3a0   :  { %p685_p5 = scmp.ne.s32.totalorder %s863_s6, %s684_s25  ;;  %p688_p6 = scmp.lt.u32.totalorder %s684_s25, %s863_s6 }
 0x3a2   :  { %p690_p7 = pnand %p688_p6, %p685_p5 }
 0x3a4   :  { %693 = shalt.err (!%p690_p7)
}
 0x3a5   :  { %518 = dma.vmem_to_hbm [thread:$0]  %s516_s21, 16, %s863_s6, [#allocation3]  }
 0x3a6   :  { %694 = dma.done.wait [#allocation3], 16  }
 0x3a7   :  { %695 = vsyncadd [#allocation3], 4294967280 }
 0x3a8   :  { %522 = vsyncpa [#allocation3], 1 }

</bundles_post_ra>
